<compile_context>
chip_gen: v7x
topology: tpu7x:2x2x1
jax: 0.10.0
libtpu: 0.0.40
codegen_flags: <defaults>
</compile_context>

<pallas_src>
import functools

import jax
import jax.numpy as jnp
from jax.experimental import pallas as pl
from jax.experimental.pallas import tpu as pltpu

_SUB = 8      # sublane granularity
_LANE = 128   # lane width


def _round_up(x: int, m: int) -> int:
    return ((x + m - 1) // m) * m


def _choose_tiles(n: int, c: int, itemsize: int, pred_tile_bytes: int, total_vmem_budget: int):
    """Pick (tn, tc): row tile (multiple of 8) and class tile (full C or multiple of 128)."""
    lane_c_full = _round_up(c, _LANE)

    # Column tile: keep the full class dim unless even an 8-row slab of it exceeds the
    # pred-tile byte budget (huge vocabularies) -> split into lane-aligned chunks.
    if _SUB * lane_c_full * itemsize <= pred_tile_bytes:
        tc = c
    else:
        tc = max(_LANE, ((pred_tile_bytes // (_SUB * itemsize)) // _LANE) * _LANE)
        tc = min(tc, lane_c_full)
    lane_c = _round_up(tc, _LANE)

    # Row tile from the byte budget. Account for the (tn,1) int32 target block, which is
    # lane-padded to (tn,128) in VMEM (512 B/row), and for double buffering (x2).
    per_row_bytes = lane_c * itemsize + _LANE * 4
    tn = min(pred_tile_bytes // max(1, lane_c * itemsize),
             (total_vmem_budget // 2) // per_row_bytes)
    tn = max(_SUB, (tn // _SUB) * _SUB)
    tn = min(tn, _round_up(max(n, 1), _SUB))
    return tn, tc


def _nll_loss_kernel(pred_ref, target_ref, out_ref, *, n_total, tc):
    # pred_ref   : (tn, tc) native dtype, VMEM
    # target_ref : (tn, 1)  int32 (padded with -1 sentinel rows), VMEM
    # out_ref    : (1, 1)   f32, SMEM (resident accumulator + final scalar)
    i = pl.program_id(0)
    j = pl.program_id(1)

    @pl.when((i == 0) & (j == 0))
    def _init():
        out_ref[0, 0] = jnp.float32(0.0)

    pred = pred_ref[...]                                   # native dtype (no full-tile cast)
    tgt = target_ref[...]                                  # (tn, 1) int32
    # Global class index of each lane; sentinel target (-1) and OOB columns (>= C) never match.
    col_ids = jax.lax.broadcasted_iota(jnp.int32, pred.shape, 1) + j * tc
    sel = col_ids == tgt                                   # one-hot (<=1 true per row)
    masked = jnp.where(sel, pred, jnp.zeros_like(pred))    # select in native dtype (exact)
    # <=1 nonzero per row => lane-axis sum is exact even in bf16; cast the small result late.
    row_sums = jnp.sum(masked, axis=-1, keepdims=True).astype(jnp.float32)
    out_ref[0, 0] += jnp.sum(row_sums)

    @pl.when((i == pl.num_programs(0) - 1) & (j == pl.num_programs(1) - 1))
    def _finalize():
        out_ref[0, 0] = -(out_ref[0, 0] / jnp.float32(n_total))


def nll_loss_pallas(pred: jax.Array, target: jax.Array, *,
                    pred_tile_bytes: int = 4 * 1024 * 1024,
                    total_vmem_budget: int = 24 * 1024 * 1024) -> jax.Array:
    """Pallas equivalent of torch.nn.functional.nll_loss(pred, target) (mean reduction)."""
    n, c = pred.shape
    itemsize = jnp.dtype(pred.dtype).itemsize

    tn, tc = _choose_tiles(n, c, itemsize, pred_tile_bytes, total_vmem_budget)
    grid_i = (n + tn - 1) // tn
    grid_j = (c + tc - 1) // tc
    n_pad = grid_i * tn

    # Pad target with an out-of-range sentinel so tail/OOB pred rows are never selected.
    target_i32 = target.astype(jnp.int32)
    if n_pad > n:
        target_i32 = jnp.pad(target_i32, (0, n_pad - n), constant_values=-1)
    target2d = target_i32.reshape(n_pad, 1)

    # VMEM budget: double-buffered pred tile + lane-padded target tile, plus headroom.
    lane_c = _round_up(tc, _LANE)
    vmem_needed = 2 * (tn * lane_c * itemsize + tn * _LANE * 4)
    vmem_limit = int(min(max(vmem_needed + (8 << 20), 16 << 20), 64 << 20))

    cost = pl.CostEstimate(
        flops=2 * n * c,
        transcendentals=0,
        bytes_accessed=n * c * itemsize + n * 4 + 4,
    )

    kernel = functools.partial(_nll_loss_kernel, n_total=n, tc=tc)

    out = pl.pallas_call(
        kernel,
        out_shape=jax.ShapeDtypeStruct((1, 1), jnp.float32),
        grid=(grid_i, grid_j),
        in_specs=[
            pl.BlockSpec((tn, tc), lambda i, j: (i, j)),   # pred tile, pipelined over N and C
            pl.BlockSpec((tn, 1), lambda i, j: (i, 0)),    # matching target rows
        ],
        out_specs=pl.BlockSpec(
            (1, 1), lambda i, j: (0, 0), memory_space=pltpu.MemorySpace.SMEM
        ),
        compiler_params=pltpu.CompilerParams(
            dimension_semantics=("arbitrary", "arbitrary"),  # single resident accumulator
            vmem_limit_bytes=vmem_limit,
        ),
        cost_estimate=cost,
    )(pred, target2d)
    return out[0, 0]


if __name__ == "__main__":
    key = jax.random.PRNGKey(0)
    k1, k2, k3, k4, k5, k6 = jax.random.split(key, 6)

    # Case 1: small classification-head shape (batch=8, classes=16), f32.
    N, C = 8, 16
    pred = jax.nn.log_softmax(jax.random.normal(k1, (N, C), dtype=jnp.float32), axis=-1)
    target = jax.random.randint(k2, (N,), 0, C, dtype=jnp.int32)
    loss = nll_loss_pallas(pred, target)
    jax.block_until_ready(loss)
    ref = -jnp.mean(pred[jnp.arange(N), target])
    assert jnp.allclose(loss, ref, atol=1e-6, rtol=1e-6), (loss, ref)

    # Case 2: bf16 log-probs (native-dtype select + late cast path).
    N2, C2 = 1040, 40
    pred2 = jax.nn.log_softmax(jax.random.normal(k3, (N2, C2), jnp.float32), -1).astype(jnp.bfloat16)
    target2 = jax.random.randint(k4, (N2,), 0, C2, dtype=jnp.int32)
    loss2 = nll_loss_pallas(pred2, target2)
    jax.block_until_ready(loss2)
    ref2 = -jnp.mean(pred2.astype(jnp.float32)[jnp.arange(N2), target2])
    assert jnp.allclose(loss2, ref2, atol=1e-4, rtol=1e-4), (loss2, ref2)

    # Case 3: tiny artificial budgets to exercise row tiling (partial tail tile +
    # sentinel-padded target) and column tiling (partial last class tile).
    N3, C3 = 1037, 272
    pred3 = jax.nn.log_softmax(jax.random.normal(k5, (N3, C3), jnp.float32), -1)
    target3 = jax.random.randint(k6, (N3,), 0, C3, dtype=jnp.int32)
    loss3 = nll_loss_pallas(pred3, target3,
                            pred_tile_bytes=8 * 1024, total_vmem_budget=64 * 1024)
    jax.block_until_ready(loss3)
    ref3 = -jnp.mean(pred3[jnp.arange(N3), target3])
    assert jnp.allclose(loss3, ref3, atol=1e-5, rtol=1e-5), (loss3, ref3)

    print("KERNEL_OK")
</pallas_src>

<mosaic_0001>
module attributes {stable_mosaic.version = 11 : i64} {
  func.func @_nll_loss_kernel(%arg0: i32, %arg1: i32, %arg2: memref<8x16xf32, #tpu.memory_space<vmem>>, %arg3: memref<8x1xi32, #tpu.memory_space<vmem>>, %arg4: memref<1x1xf32, #tpu.memory_space<smem>>) attributes {dimension_semantics = [#tpu.dimension_semantics<arbitrary>, #tpu.dimension_semantics<arbitrary>], iteration_bounds = array<i64: 1, 1>, scalar_prefetch = 0 : i64, scratch_operands = 0 : i64, tpu.core_type = #tpu.core_type<tc>, window_params = [{transform_indices = @transform_0, window_bounds = array<i64: 8, 16>}, {transform_indices = @transform_1, window_bounds = array<i64: 8, 1>}, {transform_indices = @transform_2, window_bounds = array<i64: 1, 1>}]} {
    %c0_i32 = arith.constant 0 : i32
    %0 = arith.cmpi eq, %arg0, %c0_i32 : i32
    %c0_i32_0 = arith.constant 0 : i32
    %1 = arith.cmpi eq, %arg1, %c0_i32_0 : i32
    %2 = arith.andi %0, %1 : i1
    %3 = arith.extui %2 : i1 to i32
    %c0_i32_1 = arith.constant 0 : i32
    %4 = arith.cmpi ne, %3, %c0_i32_1 : i32
    scf.if %4 {
      %cst_14 = arith.constant 0.000000e+00 : f32
      %c0_15 = arith.constant 0 : index
      %c0_16 = arith.constant 0 : index
      %29 = memref.load %arg4[%c0_15, %c0_16] : memref<1x1xf32, #tpu.memory_space<smem>>
      memref.store %cst_14, %arg4[%c0_15, %c0_16] : memref<1x1xf32, #tpu.memory_space<smem>>
    } else {
    }
    %c0 = arith.constant 0 : index
    %c0_2 = arith.constant 0 : index
    %5 = vector.load %arg2[%c0, %c0_2] : memref<8x16xf32, #tpu.memory_space<vmem>>, vector<8x16xf32>
    %c0_3 = arith.constant 0 : index
    %c0_4 = arith.constant 0 : index
    %6 = vector.load %arg3[%c0_3, %c0_4] : memref<8x1xi32, #tpu.memory_space<vmem>>, vector<8x1xi32>
    %7 = tpu.iota {dimensions = array<i32: 1>} : vector<8x16xi32>
    %c16_i32 = arith.constant 16 : i32
    %8 = arith.muli %arg1, %c16_i32 : i32
    %9 = vector.broadcast %8 : i32 to vector<8x16xi32>
    %10 = arith.addi %7, %9 : vector<8x16xi32>
    %11 = vector.broadcast %6 : vector<8x1xi32> to vector<8x16xi32>
    %12 = arith.cmpi eq, %10, %11 : vector<8x16xi32>
    %cst = arith.constant 0.000000e+00 : f32
    %13 = vector.broadcast %cst : f32 to vector<8x16xf32>
    %14 = arith.select %12, %5, %13 : vector<8x16xi1>, vector<8x16xf32>
    %cst_5 = arith.constant dense<0.000000e+00> : vector<8xf32>
    %15 = vector.multi_reduction <add>, %14, %cst_5 [1] : vector<8x16xf32> to vector<8xf32>
    %16 = vector.shape_cast %15 : vector<8xf32> to vector<8x1xf32>
    %c0_6 = arith.constant 0 : index
    %c0_7 = arith.constant 0 : index
    %17 = memref.load %arg4[%c0_6, %c0_7] : memref<1x1xf32, #tpu.memory_space<smem>>
    %18 = vector.shape_cast %16 : vector<8x1xf32> to vector<1x8x1xf32>
    %cst_8 = arith.constant dense<0.000000e+00> : vector<1xf32>
    %19 = vector.multi_reduction <add>, %18, %cst_8 [1, 2] : vector<1x8x1xf32> to vector<1xf32>
    %20 = vector.shape_cast %19 : vector<1xf32> to vector<1x1x1xf32>
    %21 = vector.extract %20[0, 0, 0] : f32 from vector<1x1x1xf32>
    %22 = arith.addf %17, %21 : f32
    %c0_9 = arith.constant 0 : index
    %c0_10 = arith.constant 0 : index
    %23 = memref.load %arg4[%c0_9, %c0_10] : memref<1x1xf32, #tpu.memory_space<smem>>
    memref.store %22, %arg4[%c0_9, %c0_10] : memref<1x1xf32, #tpu.memory_space<smem>>
    %c0_i32_11 = arith.constant 0 : i32
    %24 = arith.cmpi eq, %arg0, %c0_i32_11 : i32
    %c0_i32_12 = arith.constant 0 : i32
    %25 = arith.cmpi eq, %arg1, %c0_i32_12 : i32
    %26 = arith.andi %24, %25 : i1
    %27 = arith.extui %26 : i1 to i32
    %c0_i32_13 = arith.constant 0 : i32
    %28 = arith.cmpi ne, %27, %c0_i32_13 : i32
    scf.if %28 {
      %c0_14 = arith.constant 0 : index
      %c0_15 = arith.constant 0 : index
      %29 = memref.load %arg4[%c0_14, %c0_15] : memref<1x1xf32, #tpu.memory_space<smem>>
      %cst_16 = arith.constant 8.000000e+00 : f32
      %30 = arith.divf %29, %cst_16 : f32
      %cst_17 = arith.constant 0.000000e+00 : f32
      %31 = arith.subf %cst_17, %30 : f32
      %c0_18 = arith.constant 0 : index
      %c0_19 = arith.constant 0 : index
      %32 = memref.load %arg4[%c0_18, %c0_19] : memref<1x1xf32, #tpu.memory_space<smem>>
      memref.store %31, %arg4[%c0_18, %c0_19] : memref<1x1xf32, #tpu.memory_space<smem>>
    } else {
    }
    return
  }
  func.func @transform_0(%arg0: i32, %arg1: i32) -> (i32, i32) {
    %c0_i32 = arith.constant 0 : i32
    return %arg0, %arg1 : i32, i32
  }
  func.func @transform_1(%arg0: i32, %arg1: i32) -> (i32, i32) {
    %c0_i32 = arith.constant 0 : i32
    %c0_i32_0 = arith.constant 0 : i32
    return %arg0, %c0_i32 : i32, i32
  }
  func.func @transform_2(%arg0: i32, %arg1: i32) -> (i32, i32) {
    %c0_i32 = arith.constant 0 : i32
    %c0_i32_0 = arith.constant 0 : i32
    %c0_i32_1 = arith.constant 0 : i32
    return %c0_i32, %c0_i32_0 : i32, i32
  }
}

</mosaic_0001>

<bundles_post_ra>
// kernel: tpu_custom_call.1
= control target key start
LH: loop header
LB: loop body
LE: loop exit
PB: predicated region body
PF: predicated region fallthrough
CT: control target
= control target key end

     0   :  { %s125_s0 = inlined_call_operand.vmem [shape: f32[8,16], index: 0, kind: input, shape index: {}]   ;;  %s126_s1 = inlined_call_operand.vmem [shape: s32[8,1], index: 1, kind: input, shape index: {}]   ;;  %s127_s2 = inlined_call_operand.hbm [shape: f32[1,1], index: 2, kind: output, shape index: {}]  }
   0x1   :  { %v21_v0 = vld [vmem:[%s126_s1] sm:$0xff] }
   0x2   :  { %7 = vsyncpa [#allocation3], 0  ;;  %v90_v1 = vmov 0   ;;  %v22_v2 = vlaneseq  ;;  %v20_v4 = vld [vmem:[%s125_s0] sm:$0xff]  ;;  %vm32_vm0 = vcmask 130048   ;;  %vm37_vm2 = vcmask 7168  }
   0x3   :  { %77 = vset.pattern.permute.xlu0 %v90_v1  ;;  %s78_s16 = scalar_lea.hbm %s127_s2, 16 }
   0x4   :  { %28 = vperm.xlu0 %77, %v21_v0   ;;  %v23_v3 = vand.u32 127, %v22_v2  ;;  %p79_p0 = scmp.ne.s32.totalorder %s127_s2, %s78_s16  ;;  %p82_p1 = scmp.lt.u32.totalorder %s78_s16, %s127_s2 }
   0x6   :  { %p84_p2 = pnand %p82_p1, %p79_p0 }
  0x83   :  { %v29_v5 = vpop.permute.xlu0 %28 }
  0x84   :  { %vm30_vm1 = vcmp.eq.s32.totalorder %v23_v3, %v29_v5 }
  0x85   :  { %v31_v6 = vsel %vm30_vm1, %v20_v4, 0.0 }
  0x86   :  { %v33_v7 = vsel %vm32_vm0, %v31_v6, 0.0 }
  0x87   :  { %34 = vadd.xlane.f32.xlu0 %v33_v7 }
 0x114   :  { %v35_v8 = vpop.xlane.xlu0 %34 }
 0x115   :  { %v38_v9 = vsel %vm37_vm2, %v35_v8, 0.0 }
 0x116   :  { %39 = vadd.xlane.f32.xlu1 %v38_v9 }
 0x1a3   :  { %v40_v10 = vpop.xlane.xlu1 %39 }
 0x1a4   :  { %v41_v11 = vrot.slane %v40_v10, 4 }
 0x1a6   :  { %v42_v12 = vadd.f32 %v41_v11, %v40_v10 }
 0x1a8   :  { %v43_v13 = vrot.slane %v42_v12, 2 }
 0x1aa   :  { %v44_v14 = vadd.f32 %v43_v13, %v42_v12 }
 0x1ac   :  { %v45_v15 = vrot.slane %v44_v14, 1 }
 0x1ae   :  { %v46_v16 = vadd.f32 %v45_v15, %v44_v14 }
 0x1b0   :  { %72 = vpush %v46_v16 }
 0x1e1   :  { %s73_s1 = spop %72 }
 0x1e2   :  { %s56_s0 = smul.f32 0.125, %s73_s1 }
 0x1e4   :  { %s57_s13 = ssub.f32 0.0, %s56_s0 }
 0x1e6   :  { %58 = sst [smem:[#allocation2]] %s57_s13 }
 0x1e7   :  { %87 = shalt.err (!%p84_p2)
}
 0x1e8   :  { %s91_s21 = smov [#allocation2]  }
 0x1e9   :  { %66 = dma.smem_to_hbm %s91_s21, 16, %s127_s2, [#allocation3]  }
 0x1ea   :  { %88 = dma.done.wait [#allocation3], 16  }
 0x1eb   :  { %89 = vsyncadd [#allocation3], 4294967280 }
 0x1ec   :  { %70 = sfence }
 0x1ed   :  { %71 = vsyncpa [#allocation3], 1 }

</bundles_post_ra>
